<compile_context>
chip_gen: v6e
topology: v6e:2x2x1
jax: 0.10.0
libtpu: 0.0.40
codegen_flags: <defaults>
</compile_context>

<pallas_src>
import jax
import jax.numpy as jnp
from jax.experimental import pallas as pl
from jax.experimental.pallas import tpu as pltpu


def attention_block_kernel(s_ref, h_ref, wa_ref, ba_ref, ua_ref, bu_ref,
                           va_ref, bv_ref, out_ref, ws_ref):
    t = pl.program_id(0)

    @pl.when(t == 0)
    def _():
        # W_a(s) + b_W computed once; kept VMEM-resident across all T tiles.
        ws_ref[...] = (jnp.dot(s_ref[...], wa_ref[...],
                               preferred_element_type=jnp.float32)
                       + ba_ref[...])
        out_ref[...] = jnp.zeros_like(out_ref)

    h = h_ref[...]                                    # (B, Tt, C)
    B, Tt, C = h.shape
    F = ua_ref.shape[1]

    # U_a over flattened rows: one (B*Tt, C) x (C, F) MXU matmul (layout-preserving reshape).
    uh = (jnp.dot(h.reshape(B * Tt, C), ua_ref[...],
                  preferred_element_type=jnp.float32)
          + bu_ref[...]).reshape(B, Tt, F)

    x = jnp.tanh(uh + ws_ref[...][:, None, :])        # (B, Tt, F)

    # Energy: VPU multiply + lane reduce (no N=1 MXU matmul, no relayout).
    # va_ref is stored row-major (1, F); bv is an SMEM scalar.
    e = jnp.sum(x * va_ref[...], axis=-1, keepdims=True) + bv_ref[0, 0]   # (B, Tt, 1)

    # Partial context: sublane reduce over Tt, accumulated into the resident output block.
    out_ref[...] += jnp.sum(e * h, axis=1)            # (B, C)


def _round_up(x, m):
    return (x + m - 1) // m * m


def attention_block(s, h, wa, ba, ua, bu, va, bv, *, t_tile=None):
    """s: (B,H), h: (B,T,2H), wa: (H,F), ba: (1,F), ua: (2H,F), bu: (1,F),
    va: (F,1), bv: (1,1). Returns context (B, 2H)."""
    B, H = s.shape
    _, T, H2 = h.shape
    F = wa.shape[1]

    LANE, SUB = 128, 8
    H_p = _round_up(H, LANE)
    C_p = _round_up(H2, LANE)
    F_p = _round_up(F, LANE)

    if t_tile is None:
        # Biggest tile that is sublane-aligned; cap it so double-buffered h blocks
        # stay small even on v7x's 64 MiB VMEM at large B/T.
        t_tile = min(_round_up(T, SUB), 512)
    T_p = _round_up(T, t_tile)

    f32 = jnp.float32
    # Zero-pad to lane-dense shapes. Padded weight rows/cols and padded h lanes/rows
    # are zero, so they contribute nothing to ws/uh/e/context (output sliced back).
    s_p = jnp.zeros((B, H_p), f32).at[:, :H].set(s)
    h_p = jnp.zeros((B, T_p, C_p), f32).at[:, :T, :H2].set(h)
    wa_p = jnp.zeros((H_p, F_p), f32).at[:H, :F].set(wa)
    ba_p = jnp.zeros((1, F_p), f32).at[:, :F].set(ba)
    ua_p = jnp.zeros((C_p, F_p), f32).at[:H2, :F].set(ua)
    bu_p = jnp.zeros((1, F_p), f32).at[:, :F].set(bu)
    va_row = jnp.zeros((1, F_p), f32).at[:, :F].set(va[:, 0][None, :])   # (1, F_p)
    bv_s = bv.reshape(1, 1).astype(f32)

    grid = (T_p // t_tile,)

    out = pl.pallas_call(
        attention_block_kernel,
        out_shape=jax.ShapeDtypeStruct((B, C_p), f32),
        grid_spec=pltpu.PrefetchScalarGridSpec(
            num_scalar_prefetch=0,
            grid=grid,
            in_specs=[
                pl.BlockSpec((B, H_p), lambda t: (0, 0)),          # s (resident)
                pl.BlockSpec((B, t_tile, C_p), lambda t: (0, t, 0)),  # h, streamed over T
                pl.BlockSpec((H_p, F_p), lambda t: (0, 0)),        # W_a (resident)
                pl.BlockSpec((1, F_p), lambda t: (0, 0)),          # b_W
                pl.BlockSpec((C_p, F_p), lambda t: (0, 0)),        # U_a (resident)
                pl.BlockSpec((1, F_p), lambda t: (0, 0)),          # b_U
                pl.BlockSpec((1, F_p), lambda t: (0, 0)),          # V_a row
                pl.BlockSpec(memory_space=pltpu.MemorySpace.SMEM),  # b_V scalar
            ],
            out_specs=pl.BlockSpec((B, C_p), lambda t: (0, 0)),    # resident accumulator
            scratch_shapes=[pltpu.VMEM((B, F_p), jnp.float32)],    # ws = W_a(s)+b_W
        ),
        compiler_params=pltpu.CompilerParams(
            dimension_semantics=("arbitrary",)),
    )(s_p, h_p, wa_p, ba_p, ua_p, bu_p, va_row, bv_s)

    return out[:, :H2]


def attention_block_ref(s, h, wa, ba, ua, bu, va, bv):
    # Pure-JAX reference reproducing the torch loop semantics.
    ws = s @ wa + ba[0]                                      # (B, F)
    uh = jnp.einsum('btc,cf->btf', h, ua) + bu[0]            # (B, T, F)
    x = jnp.tanh(ws[:, None, :] + uh)                        # (B, T, F)
    e = jnp.einsum('btf,fo->bto', x, va)[..., 0] + bv[0, 0]  # (B, T)
    return jnp.sum(e[:, :, None] * h, axis=1)                # (B, 2H)


if __name__ == "__main__":
    hidden_size = 32
    d_ff = 64
    B, T = 2, 8

    key = jax.random.PRNGKey(0)
    k_s, k_h, k_wa, k_ba, k_ua, k_bu, k_va, k_bv = jax.random.split(key, 8)

    s = jax.random.normal(k_s, (B, hidden_size), dtype=jnp.float32)
    h = jax.random.normal(k_h, (B, T, 2 * hidden_size), dtype=jnp.float32)

    # torch nn.Linear-shaped parameters, stored input-major.
    wa = jax.random.normal(k_wa, (hidden_size, d_ff), dtype=jnp.float32) * 0.1
    ba = jax.random.normal(k_ba, (1, d_ff), dtype=jnp.float32) * 0.1
    ua = jax.random.normal(k_ua, (2 * hidden_size, d_ff), dtype=jnp.float32) * 0.1
    bu = jax.random.normal(k_bu, (1, d_ff), dtype=jnp.float32) * 0.1
    va = jax.random.normal(k_va, (d_ff, 1), dtype=jnp.float32) * 0.1
    bv = jax.random.normal(k_bv, (1, 1), dtype=jnp.float32) * 0.1

    out = attention_block(s, h, wa, ba, ua, bu, va, bv)
    out = jax.block_until_ready(out)

    ref = attention_block_ref(s, h, wa, ba, ua, bu, va, bv)
    assert out.shape == (B, 2 * hidden_size)
    assert jnp.allclose(out, ref, atol=1e-4, rtol=1e-4), "mismatch vs reference"

    print("KERNEL_OK")
</pallas_src>

<mosaic_0001>
module attributes {stable_mosaic.version = 11 : i64} {
  func.func @attention_block_kernel(%arg0: i32, %arg1: memref<2x128xf32, #tpu.memory_space<vmem>>, %arg2: memref<2x8x128xf32, #tpu.memory_space<vmem>>, %arg3: memref<128x128xf32, #tpu.memory_space<vmem>>, %arg4: memref<1x128xf32, #tpu.memory_space<vmem>>, %arg5: memref<128x128xf32, #tpu.memory_space<vmem>>, %arg6: memref<1x128xf32, #tpu.memory_space<vmem>>, %arg7: memref<1x128xf32, #tpu.memory_space<vmem>>, %arg8: memref<1x1xf32, #tpu.memory_space<smem>>, %arg9: memref<2x128xf32, #tpu.memory_space<vmem>>, %arg10: memref<2x128xf32, #tpu.memory_space<vmem>>) attributes {dimension_semantics = [#tpu.dimension_semantics<arbitrary>], iteration_bounds = array<i64: 1>, scalar_prefetch = 0 : i64, scratch_operands = 1 : i64, tpu.core_type = #tpu.core_type<tc>, window_params = [{pipeline_mode = #tpu.pipeline_mode<synchronous>, transform_indices = @transform_0, window_bounds = array<i64: 2, 128>}, {transform_indices = @transform_1, window_bounds = array<i64: 2, 8, 128>}, {pipeline_mode = #tpu.pipeline_mode<synchronous>, transform_indices = @transform_2, window_bounds = array<i64: 128, 128>}, {pipeline_mode = #tpu.pipeline_mode<synchronous>, transform_indices = @transform_3, window_bounds = array<i64: 1, 128>}, {pipeline_mode = #tpu.pipeline_mode<synchronous>, transform_indices = @transform_4, window_bounds = array<i64: 128, 128>}, {pipeline_mode = #tpu.pipeline_mode<synchronous>, transform_indices = @transform_5, window_bounds = array<i64: 1, 128>}, {pipeline_mode = #tpu.pipeline_mode<synchronous>, transform_indices = @transform_6, window_bounds = array<i64: 1, 128>}, {transform_indices = @transform_7, window_bounds = array<i64: 1, 1>}, {pipeline_mode = #tpu.pipeline_mode<synchronous>, transform_indices = @transform_8, window_bounds = array<i64: 2, 128>}]} {
    %c0_i32 = arith.constant 0 : i32
    %0 = arith.cmpi eq, %arg0, %c0_i32 : i32
    %1 = arith.extui %0 : i1 to i32
    %c0_i32_0 = arith.constant 0 : i32
    %2 = arith.cmpi ne, %1, %c0_i32_0 : i32
    scf.if %2 {
      %c0_19 = arith.constant 0 : index
      %c0_20 = arith.constant 0 : index
      %31 = vector.load %arg1[%c0_19, %c0_20] : memref<2x128xf32, #tpu.memory_space<vmem>>, vector<2x128xf32>
      %c0_21 = arith.constant 0 : index
      %c0_22 = arith.constant 0 : index
      %32 = vector.load %arg3[%c0_21, %c0_22] : memref<128x128xf32, #tpu.memory_space<vmem>>, vector<128x128xf32>
      %cst_23 = arith.constant dense<0.000000e+00> : vector<2x128xf32>
      %33 = tpu.matmul %31, %32, %cst_23 {dimension_numbers = #tpu.dot_dimension_numbers<[1], [0], [0], [1], [0, 0, 1, 1], [], []>} : vector<2x128xf32>, vector<128x128xf32>, vector<2x128xf32> -> vector<2x128xf32>
      %c0_24 = arith.constant 0 : index
      %c0_25 = arith.constant 0 : index
      %34 = vector.load %arg4[%c0_24, %c0_25] : memref<1x128xf32, #tpu.memory_space<vmem>>, vector<1x128xf32>
      %35 = vector.broadcast %34 : vector<1x128xf32> to vector<2x128xf32>
      %36 = arith.addf %33, %35 : vector<2x128xf32>
      %c0_26 = arith.constant 0 : index
      %c0_27 = arith.constant 0 : index
      %37 = vector.load %arg10[%c0_26, %c0_27] : memref<2x128xf32, #tpu.memory_space<vmem>>, vector<2x128xf32>
      tpu.vector_store %arg10[%c0_26, %c0_27], %36 {strides = array<i32>} : memref<2x128xf32, #tpu.memory_space<vmem>>, vector<2x128xf32>,
      %cst_28 = arith.constant 0.000000e+00 : f32
      %38 = vector.broadcast %cst_28 : f32 to vector<2x128xf32>
      %c0_29 = arith.constant 0 : index
      %c0_30 = arith.constant 0 : index
      %39 = vector.load %arg9[%c0_29, %c0_30] : memref<2x128xf32, #tpu.memory_space<vmem>>, vector<2x128xf32>
      tpu.vector_store %arg9[%c0_29, %c0_30], %38 {strides = array<i32>} : memref<2x128xf32, #tpu.memory_space<vmem>>, vector<2x128xf32>,
    } else {
    }
    %c0 = arith.constant 0 : index
    %c0_1 = arith.constant 0 : index
    %c0_2 = arith.constant 0 : index
    %3 = vector.load %arg2[%c0, %c0_1, %c0_2] : memref<2x8x128xf32, #tpu.memory_space<vmem>>, vector<2x8x128xf32>
    %4 = vector.shape_cast %3 : vector<2x8x128xf32> to vector<16x128xf32>
    %c0_3 = arith.constant 0 : index
    %c0_4 = arith.constant 0 : index
    %5 = vector.load %arg5[%c0_3, %c0_4] : memref<128x128xf32, #tpu.memory_space<vmem>>, vector<128x128xf32>
    %cst = arith.constant dense<0.000000e+00> : vector<16x128xf32>
    %6 = tpu.matmul %4, %5, %cst {dimension_numbers = #tpu.dot_dimension_numbers<[1], [0], [0], [1], [0, 0, 1, 1], [], []>} : vector<16x128xf32>, vector<128x128xf32>, vector<16x128xf32> -> vector<16x128xf32>
    %c0_5 = arith.constant 0 : index
    %c0_6 = arith.constant 0 : index
    %7 = vector.load %arg6[%c0_5, %c0_6] : memref<1x128xf32, #tpu.memory_space<vmem>>, vector<1x128xf32>
    %8 = vector.broadcast %7 : vector<1x128xf32> to vector<16x128xf32>
    %9 = arith.addf %6, %8 : vector<16x128xf32>
    %10 = vector.shape_cast %9 : vector<16x128xf32> to vector<2x8x128xf32>
    %c0_7 = arith.constant 0 : index
    %c0_8 = arith.constant 0 : index
    %11 = vector.load %arg10[%c0_7, %c0_8] : memref<2x128xf32, #tpu.memory_space<vmem>>, vector<2x128xf32>
    %12 = vector.shape_cast %11 : vector<2x128xf32> to vector<2x1x128xf32>
    %13 = vector.broadcast %12 : vector<2x1x128xf32> to vector<2x8x128xf32>
    %14 = arith.addf %10, %13 : vector<2x8x128xf32>
    %15 = math.tanh %14 : vector<2x8x128xf32>
    %c0_9 = arith.constant 0 : index
    %c0_10 = arith.constant 0 : index
    %16 = vector.load %arg7[%c0_9, %c0_10] : memref<1x128xf32, #tpu.memory_space<vmem>>, vector<1x128xf32>
    %17 = vector.shape_cast %16 : vector<1x128xf32> to vector<1x1x128xf32>
    %18 = vector.broadcast %17 : vector<1x1x128xf32> to vector<2x8x128xf32>
    %19 = arith.mulf %15, %18 : vector<2x8x128xf32>
    %cst_11 = arith.constant dense<0.000000e+00> : vector<2x8xf32>
    %20 = vector.multi_reduction <add>, %19, %cst_11 [2] : vector<2x8x128xf32> to vector<2x8xf32>
    %21 = vector.shape_cast %20 : vector<2x8xf32> to vector<2x8x1xf32>
    %c0_12 = arith.constant 0 : index
    %c0_13 = arith.constant 0 : index
    %22 = memref.load %arg8[%c0_12, %c0_13] : memref<1x1xf32, #tpu.memory_space<smem>>
    %23 = vector.broadcast %22 : f32 to vector<2x8x1xf32>
    %24 = arith.addf %21, %23 : vector<2x8x1xf32>
    %c0_14 = arith.constant 0 : index
    %c0_15 = arith.constant 0 : index
    %25 = vector.load %arg9[%c0_14, %c0_15] : memref<2x128xf32, #tpu.memory_space<vmem>>, vector<2x128xf32>
    %26 = vector.broadcast %24 : vector<2x8x1xf32> to vector<2x8x128xf32>
    %27 = arith.mulf %26, %3 : vector<2x8x128xf32>
    %cst_16 = arith.constant dense<0.000000e+00> : vector<2x128xf32>
    %28 = vector.multi_reduction <add>, %27, %cst_16 [1] : vector<2x8x128xf32> to vector<2x128xf32>
    %29 = arith.addf %25, %28 : vector<2x128xf32>
    %c0_17 = arith.constant 0 : index
    %c0_18 = arith.constant 0 : index
    %30 = vector.load %arg9[%c0_17, %c0_18] : memref<2x128xf32, #tpu.memory_space<vmem>>, vector<2x128xf32>
    tpu.vector_store %arg9[%c0_17, %c0_18], %29 {strides = array<i32>} : memref<2x128xf32, #tpu.memory_space<vmem>>, vector<2x128xf32>,
    return
  }
  func.func @transform_0(%arg0: i32) -> (i32, i32) {
    %c0_i32 = arith.constant 0 : i32
    %c0_i32_0 = arith.constant 0 : i32
    %c0_i32_1 = arith.constant 0 : i32
    return %c0_i32, %c0_i32_0 : i32, i32
  }
  func.func @transform_1(%arg0: i32) -> (i32, i32, i32) {
    %c0_i32 = arith.constant 0 : i32
    %c0_i32_0 = arith.constant 0 : i32
    %c0_i32_1 = arith.constant 0 : i32
    return %c0_i32, %arg0, %c0_i32_0 : i32, i32, i32
  }
  func.func @transform_2(%arg0: i32) -> (i32, i32) {
    %c0_i32 = arith.constant 0 : i32
    %c0_i32_0 = arith.constant 0 : i32
    %c0_i32_1 = arith.constant 0 : i32
    return %c0_i32, %c0_i32_0 : i32, i32
  }
  func.func @transform_3(%arg0: i32) -> (i32, i32) {
    %c0_i32 = arith.constant 0 : i32
    %c0_i32_0 = arith.constant 0 : i32
    %c0_i32_1 = arith.constant 0 : i32
    return %c0_i32, %c0_i32_0 : i32, i32
  }
  func.func @transform_4(%arg0: i32) -> (i32, i32) {
    %c0_i32 = arith.constant 0 : i32
    %c0_i32_0 = arith.constant 0 : i32
    %c0_i32_1 = arith.constant 0 : i32
    return %c0_i32, %c0_i32_0 : i32, i32
  }
  func.func @transform_5(%arg0: i32) -> (i32, i32) {
    %c0_i32 = arith.constant 0 : i32
    %c0_i32_0 = arith.constant 0 : i32
    %c0_i32_1 = arith.constant 0 : i32
    return %c0_i32, %c0_i32_0 : i32, i32
  }
  func.func @transform_6(%arg0: i32) -> (i32, i32) {
    %c0_i32 = arith.constant 0 : i32
    %c0_i32_0 = arith.constant 0 : i32
    %c0_i32_1 = arith.constant 0 : i32
    return %c0_i32, %c0_i32_0 : i32, i32
  }
  func.func @transform_7(%arg0: i32) -> (i32, i32) {
    %c0_i32 = arith.constant 0 : i32
    %c0_i32_0 = arith.constant 0 : i32
    %c0_i32_1 = arith.constant 0 : i32
    return %c0_i32, %c0_i32_0 : i32, i32
  }
  func.func @transform_8(%arg0: i32) -> (i32, i32) {
    %c0_i32 = arith.constant 0 : i32
    %c0_i32_0 = arith.constant 0 : i32
    %c0_i32_1 = arith.constant 0 : i32
    return %c0_i32, %c0_i32_0 : i32, i32
  }
}

</mosaic_0001>

<bundles_post_ra>
// kernel: tpu_custom_call.1
= control target key start
LH: loop header
LB: loop body
LE: loop exit
PB: predicated region body
PF: predicated region fallthrough
CT: control target
= control target key end

     0   :  { %14 = vsyncpa [#allocation5], 0  ;;  %s672_s0 = inlined_call_operand.vmem [shape: f32[2,128], index: 0, kind: input, shape index: {}]   ;;  %s673_s1 = inlined_call_operand.hbm [shape: f32[2,8,128], index: 1, kind: input, shape index: {}]   ;;  %s674_s2 = inlined_call_operand.hbm [shape: f32[128,128], index: 2, kind: input, shape index: {}]   ;;  %s675_s3 = inlined_call_operand.vmem [shape: f32[1,128], index: 3, kind: input, shape index: {}]   ;;  %s676_s4 = inlined_call_operand.hbm [shape: f32[128,128], index: 4, kind: input, shape index: {}]   ;;  %s677_s5 = inlined_call_operand.vmem [shape: f32[1,128], index: 5, kind: input, shape index: {}]   ;;  %s678_s6 = inlined_call_operand.vmem [shape: f32[1,128], index: 6, kind: input, shape index: {}]   ;;  %s679_s7 = inlined_call_operand.<no memory space> [shape: f32[1,1], index: 7, kind: input, shape index: {}]   ;;  %s680_s8 = inlined_call_operand.hbm [shape: f32[2,128], index: 8, kind: output, shape index: {}]  }
   0x1   :  { %15 = vsyncpa [#allocation8], 0 }
   0x2   :  { %16 = vsyncpa [#allocation6], 0  ;;  %s573_s27 = smov [#allocation7]   ;;  %s574_s29 = smov [#allocation4]  }
   0x3   :  { %s36_s28 = sshll.u32 %s573_s27, 4  ;;  %s24_s30 = sshll.u32 %s574_s29, 4  ;;  %s37_s28 = int_to_ptr.vmem [resolvable:$true] %s36_s28  ;;  %s25_s30 = int_to_ptr.vmem [resolvable:$true] %s24_s30 }
   0x4   :  { %s495_s9 = scalar_lea.vmem %s37_s28, 2048  ;;  %p500_p1 = scmp.lt.s32.totalorder %s37_s28, %s37_s28 }
   0x5   :  { %p496_p0 = scmp.ne.s32.totalorder %s37_s28, %s495_s9  ;;  %p501_p2 = scmp.lt.s32.totalorder %s495_s9, %s495_s9 }
   0x7   :  { %p502_p3 = por %p501_p2, %p500_p1 }
   0x9   :  { %p503_p4 = pnand %p502_p3, %p496_p0 }
   0xb   :  { %506 = shalt.err (!%p503_p4)
}
   0xc   :  { %s575_s10 = smov 128   ;;  %s576_s11 = smov 8  }
   0xd   :  { %42 = dma.hbm_to_vmem [thread:$0]  %s674_s2, 2048, %s37_s28, [#allocation8], %s575_s10, %s575_s10, %s576_s11  }
   0xe   :  { %s515_s14 = scalar_lea.vmem %s25_s30, 256  ;;  %p520_p6 = scmp.lt.s32.totalorder %s25_s30, %s25_s30 }
   0xf   :  { %p516_p5 = scmp.ne.s32.totalorder %s25_s30, %s515_s14  ;;  %p521_p7 = scmp.lt.s32.totalorder %s515_s14, %s515_s14 }
  0x11   :  { %p522_p8 = por %p521_p7, %p520_p6 }
  0x13   :  { %p523_p9 = pnand %p522_p8, %p516_p5 }
  0x15   :  { %526 = shalt.err (!%p523_p9)
}
  0x16   :  { %30 = dma.hbm_to_vmem [thread:$0]  %s673_s1, 256, %s25_s30, [#allocation5], %s575_s10, %s575_s10, %s576_s11  }
  0x17   :  { %s577_s17 = smov [#allocation9]  }
  0x18   :  { %s50_s18 = sshll.u32 %s577_s17, 4  ;;  %s51_s18 = int_to_ptr.vmem [resolvable:$true] %s50_s18 }
  0x19   :  { %s535_s19 = scalar_lea.vmem %s51_s18, 2048  ;;  %p540_p11 = scmp.lt.s32.totalorder %s51_s18, %s51_s18 }
  0x1a   :  { %p536_p10 = scmp.ne.s32.totalorder %s51_s18, %s535_s19  ;;  %p541_p12 = scmp.lt.s32.totalorder %s535_s19, %s535_s19 }
  0x1c   :  { %p542_p13 = por %p541_p12, %p540_p11 }
  0x1e   :  { %p543_p0 = pnand %p542_p13, %p536_p10 }
  0x20   :  { %546 = shalt.err (!%p543_p0)
}
  0x21   :  { %56 = dma.hbm_to_vmem [thread:$0]  %s676_s4, 2048, %s51_s18, [#allocation8], %s575_s10, %s575_s10, %s576_s11  }
  0x22   :  { %567 = dma.done.wait [#allocation5], 256  }
  0x23   :  { %568 = vsyncadd [#allocation5], 4294967040 }
  0x24   :  { %569 = dma.done.wait [#allocation8], 4096  }
  0x25   :  { %570 = vsyncadd [#allocation8], 4294963200  ;;  %v578_v0 = vmov 0.0   ;;  %vm579_vm0 = vmmov 0   ;;  %v92_v1 = vld [vmem:[#allocation7 + $0x78] sm:$0xff]  ;;  %v91_v2 = vld [vmem:[#allocation7 + $0x70] sm:$0xff]  ;;  %v285_v39 = vlaneseq }
  0x26   :  { %404 = vmatprep.subr.mxu0 %v578_v0  ;;  %171 = vst [vmem:[#allocation10] sm:$0x3] %v578_v0  ;;  %436 = vmatprep.mubr.msk.f32.mxu0 %vm579_vm0, %v578_v0  ;;  %v189_v3 = vld [vmem:[#allocation9 + $0x78] sm:$0xff]  ;;  %v90_v4 = vld [vmem:[#allocation7 + $0x68] sm:$0xff]  ;;  %v188_v5 = vld [vmem:[#allocation9 + $0x70] sm:$0xff]  ;;  %vm344_vm1 = vcmask 1041409  }
  0x27   :  { %405 = vmatpush3.msra.mxu0 %v92_v1  ;;  %439 = vmatprep.subr.mxu1 %v189_v3  ;;  %v187_v6 = vld [vmem:[#allocation9 + $0x68] sm:$0xff]  ;;  %v89_v7 = vld [vmem:[#allocation7 + $0x60] sm:$0xff]  ;;  %v88_v9 = vld [vmem:[#allocation7 + $0x58] sm:$0xff]  ;;  %v580_v37 = vmov 1966171168   ;;  %v286_v44 = vshrl.u32 %v285_v39, 7  ;;  %v324_v1 = vstv %s679_s7 }
  0x28   :  { %406 = vmatprep.subr.mxu0 %v578_v0  ;;  %440 = vmatpush3.msra.mxu1 %v189_v3  ;;  %v186_v8 = vld [vmem:[#allocation9 + $0x60] sm:$0xff]  ;;  %v185_v10 = vld [vmem:[#allocation9 + $0x58] sm:$0xff]  ;;  %v87_v11 = vld [vmem:[#allocation7 + $0x50] sm:$0xff]  ;;  %v283_v38 = vunpack.c.l.s4 %v580_v37 }
  0x29   :  { %407 = vmatpush3.msra.mxu0 %v91_v2  ;;  %441 = vmatprep.subr.mxu1 %v188_v5  ;;  %v184_v12 = vld [vmem:[#allocation9 + $0x50] sm:$0xff]  ;;  %v86_v13 = vld [vmem:[#allocation7 + $0x48] sm:$0xff]  ;;  %v85_v15 = vld [vmem:[#allocation7 + $0x40] sm:$0xff]  ;;  %v298_v47 = vsub.s32 0, %v286_v44 }
  0x2a   :  { %408 = vmatprep.subr.mxu0 %v578_v0  ;;  %442 = vmatpush3.msra.mxu1 %v188_v5  ;;  %v183_v14 = vld [vmem:[#allocation9 + $0x48] sm:$0xff]  ;;  %v182_v16 = vld [vmem:[#allocation9 + $0x40] sm:$0xff]  ;;  %v84_v17 = vld [vmem:[#allocation7 + $0x38] sm:$0xff]  ;;  %v284_v43 = vunpack.c.0.s8 %v283_v38 }
  0x2b   :  { %409 = vmatpush3.msra.mxu0 %v90_v4  ;;  %443 = vmatprep.subr.mxu1 %v187_v6  ;;  %v181_v18 = vld [vmem:[#allocation9 + $0x38] sm:$0xff]  ;;  %v83_v19 = vld [vmem:[#allocation7 + $0x30] sm:$0xff]  ;;  %v82_v21 = vld [vmem:[#allocation7 + $0x28] sm:$0xff] }
  0x2c   :  { %410 = vmatprep.subr.mxu0 %v578_v0  ;;  %444 = vmatpush3.msra.mxu1 %v187_v6  ;;  %v180_v20 = vld [vmem:[#allocation9 + $0x30] sm:$0xff]  ;;  %v179_v22 = vld [vmem:[#allocation9 + $0x28] sm:$0xff]  ;;  %v81_v23 = vld [vmem:[#allocation7 + $0x20] sm:$0xff]  ;;  %v287_v46 = vsub.s32 %v284_v43, %v286_v44 }
  0x2d   :  { %411 = vmatpush3.msra.mxu0 %v89_v7  ;;  %445 = vmatprep.subr.mxu1 %v186_v8  ;;  %v178_v24 = vld [vmem:[#allocation9 + $0x20] sm:$0xff]  ;;  %v80_v25 = vld [vmem:[#allocation7 + $0x18] sm:$0xff]  ;;  %v79_v27 = vld [vmem:[#allocation7 + $0x10] sm:$0xff] }
  0x2e   :  { %412 = vmatprep.subr.mxu0 %v578_v0  ;;  %446 = vmatpush3.msra.mxu1 %v186_v8  ;;  %v177_v26 = vld [vmem:[#allocation9 + $0x18] sm:$0xff]  ;;  %v176_v28 = vld [vmem:[#allocation9 + $0x10] sm:$0xff]  ;;  %v78_v29 = vld [vmem:[#allocation7 + $0x8] sm:$0xff] }
  0x2f   :  { %413 = vmatpush3.msra.mxu0 %v88_v9  ;;  %447 = vmatprep.subr.mxu1 %v185_v10  ;;  %v175_v30 = vld [vmem:[#allocation9 + $0x8] sm:$0xff]  ;;  %v77_v31 = vld [vmem:[#allocation7] sm:$0xff]  ;;  %v172_v34 = vld [vmem:[#allocation4] sm:$0xff] }
  0x30   :  { %414 = vmatprep.subr.mxu0 %v578_v0  ;;  %448 = vmatpush3.msra.mxu1 %v185_v10  ;;  %v76_v32 = vld [vmem:[%s672_s0] sm:$0x3]  ;;  %v174_v33 = vld [vmem:[#allocation9] sm:$0xff]  ;;  %v173_v35 = vld [vmem:[#allocation4 + $0x8] sm:$0xff] }
  0x31   :  { %415 = vmatpush3.msra.mxu0 %v87_v11  ;;  %449 = vmatprep.subr.mxu1 %v184_v12  ;;  %v365_v36 = vld [vmem:[%s675_s3] ss:$0 sm:$0xff] }
  0x32   :  { %416 = vmatprep.subr.mxu0 %v578_v0  ;;  %450 = vmatpush3.msra.mxu1 %v184_v12  ;;  %v366_v48 = vld [vmem:[%s677_s5] ss:$0 sm:$0xff] }
  0x33   :  { %417 = vmatpush3.msra.mxu0 %v86_v13  ;;  %451 = vmatprep.subr.mxu1 %v183_v14  ;;  %v368_v60 = vld [vmem:[%s678_s6] ss:$0 sm:$0xff]  ;;  %s581_s6 = smov [#allocation10]  }
  0x34   :  { %418 = vmatprep.subr.mxu0 %v578_v0  ;;  %452 = vmatpush3.msra.mxu1 %v183_v14  ;;  %s355_s7 = sshll.u32 %s581_s6, 4  ;;  %s356_s7 = int_to_ptr.vmem [resolvable:$true] %s355_s7 }
  0x35   :  { %419 = vmatpush3.msra.mxu0 %v85_v15  ;;  %453 = vmatprep.subr.mxu1 %v182_v16  ;;  %s547_s26 = scalar_lea.vmem %s356_s7, 32  ;;  %p552_p2 = scmp.lt.s32.totalorder %s356_s7, %s356_s7 }
  0x36   :  { %420 = vmatprep.subr.mxu0 %v578_v0  ;;  %454 = vmatpush3.msra.mxu1 %v182_v16  ;;  %p548_p1 = scmp.ne.s32.totalorder %s356_s7, %s547_s26  ;;  %p553_p3 = scmp.lt.s32.totalorder %s547_s26, %s547_s26 }
  0x37   :  { %421 = vmatpush3.msra.mxu0 %v84_v17  ;;  %455 = vmatprep.subr.mxu1 %v181_v18 }
  0x38   :  { %422 = vmatprep.subr.mxu0 %v578_v0  ;;  %456 = vmatpush3.msra.mxu1 %v181_v18  ;;  %p554_p4 = por %p553_p3, %p552_p2 }
  0x39   :  { %423 = vmatpush3.msra.mxu0 %v83_v19  ;;  %457 = vmatprep.subr.mxu1 %v180_v20 }
  0x3a   :  { %424 = vmatprep.subr.mxu0 %v578_v0  ;;  %458 = vmatpush3.msra.mxu1 %v180_v20  ;;  %v327_v20 = vld [vmem:[#allocation10] sm:$0x3]  ;;  %p555_p5 = pnand %p554_p4, %p548_p1 }
  0x3b   :  { %425 = vmatpush3.msra.mxu0 %v82_v21  ;;  %459 = vmatprep.subr.mxu1 %v179_v22 }
  0x3c   :  { %426 = vmatprep.subr.mxu0 %v578_v0  ;;  %460 = vmatpush3.msra.mxu1 %v179_v22 }
  0x3d   :  { %427 = vmatpush3.msra.mxu0 %v81_v23  ;;  %461 = vmatprep.subr.mxu1 %v178_v24 }
  0x3e   :  { %428 = vmatprep.subr.mxu0 %v578_v0  ;;  %462 = vmatpush3.msra.mxu1 %v178_v24 }
  0x3f   :  { %429 = vmatpush3.msra.mxu0 %v80_v25  ;;  %463 = vmatprep.subr.mxu1 %v177_v26 }
  0x40   :  { %430 = vmatprep.subr.mxu0 %v578_v0  ;;  %464 = vmatpush3.msra.mxu1 %v177_v26 }
  0x41   :  { %431 = vmatpush3.msra.mxu0 %v79_v27  ;;  %465 = vmatprep.subr.mxu1 %v176_v28 }
  0x42   :  { %432 = vmatprep.subr.mxu0 %v578_v0  ;;  %466 = vmatpush3.msra.mxu1 %v176_v28 }
  0x43   :  { %433 = vmatpush3.msra.mxu0 %v78_v29  ;;  %467 = vmatprep.subr.mxu1 %v175_v30 }
  0x44   :  { %434 = vmatprep.subr.mxu0 %v578_v0  ;;  %468 = vmatpush3.msra.mxu1 %v175_v30 }
  0x45   :  { %435 = vmatpush3.msra.mxu0 %v77_v31  ;;  %469 = vmatprep.subr.mxu1 %v174_v33 }
  0x46   :  { %437 = vmatmul.mubr.f32.vlgmr.msra.gmra.mxu0 %v76_v32  ;;  %470 = vmatpush3.msra.mxu1 %v174_v33 }
  0x47   :  { %471 = vmatprep.mubr.f32.mxu1 %v172_v34 }
  0x48   :  { %472 = vmatmul.mubr.f32.vlgmr.msra.gmra.mxu1 %v173_v35 }
 0x106   :  { %v166_v40 = vpop.f32.mrf.mxu0 }
 0x107   :  { %v167_v41 = vadd.f32 %v365_v36, %v166_v40 }
 0x108   :  { %v438_v42 = vpop.f32.mrf.mxu0  ;;  %v473_v45 = vpop.f32.mrf.mxu1 }
 0x109   :  { %170 = vst [vmem:[#allocation2] sm:$0x3] %v167_v41  ;;  %v269_v56 = vadd.f32 %v473_v45, %v366_v48 }
 0x10a   :  { %v263_v50 = vpop.f32.mrf.mxu1 }
 0x10b   :  { %v264_v54 = vadd.f32 %v366_v48, %v263_v50 }
 0x110   :  { %v367_v49 = vld.sshfl [vmem:[#allocation2] sm:$0x11 pattern:$0x75316420] }
 0x111   :  { %v281_v51 = vcombine.high %v367_v49, %v367_v49  ;;  %v288_v52 = vrot.slane %v367_v49, %v287_v46 }
 0x113   :  { %v295_v53 = vrot.slane %v281_v51, %v287_v46  ;;  %v299_v55 = vrot.slane %v288_v52, %v298_v47 }
 0x115   :  { %v303_v57 = vrot.slane %v295_v53, %v298_v47  ;;  %v306_v58 = vadd.f32 %v299_v55, %v264_v54 }
 0x117   :  { %v307_v59 = vadd.f32 %v303_v57, %v269_v56  ;;  %483 = vtanh.f32 %v306_v58 }
 0x119   :  { %485 = vtanh.f32 %v307_v59 }
 0x124   :  { %v484_v61 = vpop.eup %483 }
 0x125   :  { %v317_v62 = vmul.f32 %v484_v61, %v368_v60 }
 0x126   :  { %v486_v63 = vpop.eup %485 }
 0x127   :  { %319 = vadd.xlane.f32.xlu0 %v317_v62  ;;  %v318_v0 = vmul.f32 %v486_v63, %v368_v60 }
 0x12b   :  { %321 = vadd.xlane.f32.xlu0 %v318_v0 }
 0x1b0   :  { %v320_v2 = vpop.xlane.xlu0 %319 }
 0x1b1   :  { %v325_v3 = vadd.f32 %v324_v1, %v320_v2 }
 0x1b3   :  { %v328_v4 = vmul.f32 %v325_v3, %v172_v34 }
 0x1b4   :  { %v322_v5 = vpop.xlane.xlu0 %321 }
 0x1b5   :  { %v330_v6 = vrot.slane %v328_v4, 4  ;;  %v326_v7 = vadd.f32 %v324_v1, %v322_v5 }
 0x1b7   :  { %v331_v8 = vadd.f32 %v330_v6, %v328_v4  ;;  %v329_v9 = vmul.f32 %v326_v7, %v173_v35 }
 0x1b9   :  { %v332_v10 = vrot.slane %v331_v8, 2  ;;  %v336_v11 = vrot.slane %v329_v9, 4 }
 0x1bb   :  { %v333_v12 = vadd.f32 %v332_v10, %v331_v8  ;;  %v337_v13 = vadd.f32 %v336_v11, %v329_v9 }
 0x1bd   :  { %v338_v14 = vrot.slane %v337_v13, 2  ;;  %v334_v15 = vrot.slane %v333_v12, 1 }
 0x1bf   :  { %v339_v16 = vadd.f32 %v338_v14, %v337_v13  ;;  %v335_v18 = vadd.f32 %v334_v15, %v333_v12 }
 0x1c1   :  { %v340_v17 = vrot.slane %v339_v16, 1 }
 0x1c3   :  { %v341_v19 = vadd.f32 %v340_v17, %v339_v16 }
 0x1c5   :  { %v345_v21 = vsel %vm344_vm1, %v341_v19, %v335_v18 }
 0x1c6   :  { %v347_v22 = vadd.f32 %v345_v21, %v327_v20 }
 0x1c8   :  { %348 = vst [vmem:[#allocation10] sm:$0x3] %v347_v22 }
 0x1c9   :  { %558 = shalt.err (!%p555_p5)
}
 0x1ca   :  { %358 = dma.vmem_to_hbm [thread:$0]  %s356_s7, 32, %s680_s8, [#allocation6]  }
 0x1cb   :  { %571 = dma.done.wait [#allocation6], 32  }
 0x1cc   :  { %572 = vsyncadd [#allocation6], 4294967264 }
 0x1cd   :  { %362 = vsyncpa [#allocation5], 1 }
 0x1ce   :  { %363 = vsyncpa [#allocation8], 1 }
 0x1cf   :  { %364 = vsyncpa [#allocation6], 1 }

</bundles_post_ra>
